<compile_context>
chip_gen: v7x
topology: tpu7x:2x2x1
jax: 0.10.0
libtpu: 0.0.40
codegen_flags: <defaults>
</compile_context>

<pallas_src>
import jax
import jax.numpy as jnp
from jax import lax
from jax.experimental import pallas as pl
from jax.experimental.pallas import tpu as pltpu


def _make_kernel(cin, cout, hh, ww, ho, wo):
    """Build the fused kernel for static spatial sizes (H, W) -> (Ho, Wo)."""
    pin = hh * ww
    pout = ho * wo
    inv_wo = 1.0 / wo

    def kernel(x_ref, oth_ref, par_ref, out_ref, y_scr):
        # par_ref packs [Wf | bf | db] as (cout, cin + 2)
        w = par_ref[:, 0:cin]                      # (cout, cin)  fused weight
        bf = par_ref[:, cin:cin + 1]               # (cout, 1)    fused bias
        db = par_ref[:, cin + 1:cin + 2]           # (cout, 1)    b2 - bf (outer ring)

        # 1) Fused 1x1+1x1 conv: ONE MXU matmul over the *unpadded* pixels.
        y_scr[...] = jnp.dot(w, x_ref[...], preferred_element_type=jnp.float32)

        # 2) Base canvas = bias map + other, written over the full output block.
        #    Ring mask built in-kernel from a lane iota; row = p // Wo computed
        #    exactly via floor((p + 0.5) / Wo) in f32 (no vector integer div).
        p = lax.broadcasted_iota(jnp.int32, (1, pout), 1)
        row = jnp.floor((p.astype(jnp.float32) + 0.5) * inv_wo).astype(jnp.int32)
        col = p - row * wo
        ring = (row == 0) | (row == ho - 1) | (col == 0) | (col == wo - 1)
        bias = bf + db * ring.astype(jnp.float32)          # (cout, pout)
        out_ref[...] = oth_ref[...] + bias

        # 3) Scatter-add the matmul result into the interior (2-pixel border of
        #    the output is pure bias+other).  Static unrolled per-row copies:
        #    all-channel (sublane-aligned) 64-lane slabs, VMEM-only work.
        for h in range(hh):
            dst = (h + 2) * wo + 2
            src = h * ww
            out_ref[:, dst:dst + ww] = (
                out_ref[:, dst:dst + ww] + y_scr[:, src:src + ww]
            )

    return kernel


def model_forward(x_nchw, other_nchw, params):
    """x: (N, 32, H, W) f32; other: (N, 6, H+4, W+4) f32 -> (N, 6, H+4, W+4)."""
    w1, b1, w2, b2 = params            # w1: (32,6), b1: (6,), w2: (6,6), b2: (6,)
    n, cin, hh, ww = x_nchw.shape
    cout = w2.shape[1]
    ho, wo = hh + 4, ww + 4            # two 1x1 convs, each with padding=1
    pin, pout = hh * ww, ho * wo

    # One sample per block; plenty for the module's shapes (64x64 -> 512 KiB).
    # TODO(synk): row-tile the pixel axis if a single sample ever exceeds VMEM.
    assert cin * pin * 4 <= 12 * 1024 * 1024, "per-sample block too large for VMEM"

    # Fold the two 1x1 convs into a single affine map (exact up to f32 reassoc).
    wf = jnp.transpose(w1 @ w2).astype(jnp.float32)        # (cout, cin)
    bf = (b1 @ w2 + b2).astype(jnp.float32)                # (cout,)
    db = b2.astype(jnp.float32) - bf                       # (cout,)  outer-ring delta
    par = jnp.concatenate([wf, bf[:, None], db[:, None]], axis=1)  # (cout, cin+2)

    x_flat = x_nchw.astype(jnp.float32).reshape(n, cin, pin)        # free reshape
    oth_flat = other_nchw.astype(jnp.float32).reshape(n, cout, pout)  # free reshape

    kernel = _make_kernel(cin, cout, hh, ww, ho, wo)

    cost = pl.CostEstimate(
        flops=2 * n * cout * cin * pin + 4 * n * cout * pout,
        transcendentals=0,
        bytes_accessed=4 * (n * cin * pin + 2 * n * cout * pout + cout * (cin + 2)),
    )

    out_flat = pl.pallas_call(
        kernel,
        out_shape=jax.ShapeDtypeStruct((n, cout, pout), jnp.float32),
        grid_spec=pltpu.PrefetchScalarGridSpec(
            num_scalar_prefetch=0,
            grid=(n,),
            in_specs=[
                pl.BlockSpec((None, cin, pin), lambda i: (i, 0, 0)),    # unpadded x
                pl.BlockSpec((None, cout, pout), lambda i: (i, 0, 0)),  # other
                pl.BlockSpec((cout, cin + 2), lambda i: (0, 0)),        # packed params
            ],
            out_specs=pl.BlockSpec((None, cout, pout), lambda i: (i, 0, 0)),
            scratch_shapes=[pltpu.VMEM((cout, pin), jnp.float32)],      # matmul result
        ),
        compiler_params=pltpu.CompilerParams(
            dimension_semantics=("parallel",),
            vmem_limit_bytes=32 * 1024 * 1024,
        ),
        cost_estimate=cost,
    )(x_flat, oth_flat, par)

    return out_flat.reshape(n, cout, ho, wo)


def init_params(key):
    k1, k2, k3, k4 = jax.random.split(key, 4)
    # deterministic synthetic init; torch conv weight (6,32,1,1) -> (32,6) matrix
    w1 = jax.random.normal(k1, (32, 6), jnp.float32) * 0.1
    b1 = jax.random.normal(k2, (6,), jnp.float32) * 0.1
    w2 = jax.random.normal(k3, (6, 6), jnp.float32) * 0.1
    b2 = jax.random.normal(k4, (6,), jnp.float32) * 0.1
    return (w1, b1, w2, b2)


def _reference(x_nchw, other_nchw, params):
    """Plain-JAX reference (un-fused, true conv semantics) for sanity checking."""
    w1, b1, w2, b2 = params
    x = jnp.transpose(x_nchw, (0, 2, 3, 1))
    x = jnp.pad(x, ((0, 0), (1, 1), (1, 1), (0, 0)))          # conv1 padding
    h = jnp.einsum("nhwc,cd->nhwd", x, w1) + b1               # conv1 (1x1)
    h = jnp.pad(h, ((0, 0), (1, 1), (1, 1), (0, 0)))          # conv2 padding
    y = jnp.einsum("nhwc,cd->nhwd", h, w2) + b2               # conv2 (1x1)
    y = y + jnp.transpose(other_nchw, (0, 2, 3, 1))
    return jnp.transpose(y, (0, 3, 1, 2))


if __name__ == "__main__":
    key = jax.random.PRNGKey(0)
    kp, kx, ko = jax.random.split(key, 3)

    params = init_params(kp)

    # Small shapes consistent with the module: batch=2, in_channels=32, 16x16
    N, Cin, H, W = 2, 32, 16, 16
    x = jax.random.normal(kx, (N, Cin, H, W), jnp.float32)
    # torch uses randn(v1.shape) when `other` is None; supplied deterministically here
    other = jax.random.normal(ko, (N, 6, H + 4, W + 4), jnp.float32)

    fwd = jax.jit(model_forward)
    out = jax.block_until_ready(fwd(x, other, params))

    ref = _reference(x, other, params)
    assert out.shape == (N, 6, H + 4, W + 4), out.shape
    assert jnp.allclose(out, ref, atol=1e-4, rtol=1e-4), float(
        jnp.max(jnp.abs(out - ref))
    )

    print("KERNEL_OK")
</pallas_src>

<mosaic_0001>
module attributes {stable_mosaic.version = 11 : i64} {
  func.func @kernel(%arg0: i32, %arg1: memref<1x32x256xf32, #tpu.memory_space<vmem>>, %arg2: memref<1x6x400xf32, #tpu.memory_space<vmem>>, %arg3: memref<6x34xf32, #tpu.memory_space<vmem>>, %arg4: memref<1x6x400xf32, #tpu.memory_space<vmem>>, %arg5: memref<6x256xf32, #tpu.memory_space<vmem>>) attributes {dimension_semantics = [#tpu.dimension_semantics<parallel>], iteration_bounds = array<i64: 2>, scalar_prefetch = 0 : i64, scratch_operands = 1 : i64, tpu.core_type = #tpu.core_type<tc>, window_params = [{transform_indices = @transform_0, window_bounds = array<i64: 1, 32, 256>}, {transform_indices = @transform_1, window_bounds = array<i64: 1, 6, 400>}, {pipeline_mode = #tpu.pipeline_mode<synchronous>, transform_indices = @transform_2, window_bounds = array<i64: 6, 34>}, {transform_indices = @transform_3, window_bounds = array<i64: 1, 6, 400>}]} {
    %c0 = arith.constant 0 : index
    %c0_0 = arith.constant 0 : index
    %0 = vector.load %arg3[%c0, %c0_0] : memref<6x34xf32, #tpu.memory_space<vmem>>, vector<6x32xf32>
    %c0_1 = arith.constant 0 : index
    %c32 = arith.constant 32 : index
    %1 = vector.load %arg3[%c0_1, %c32] : memref<6x34xf32, #tpu.memory_space<vmem>>, vector<6x1xf32>
    %c0_2 = arith.constant 0 : index
    %c33 = arith.constant 33 : index
    %2 = vector.load %arg3[%c0_2, %c33] : memref<6x34xf32, #tpu.memory_space<vmem>>, vector<6x1xf32>
    %c0_3 = arith.constant 0 : index
    %c0_4 = arith.constant 0 : index
    %c0_5 = arith.constant 0 : index
    %3 = vector.load %arg1[%c0_3, %c0_4, %c0_5] : memref<1x32x256xf32, #tpu.memory_space<vmem>>, vector<1x32x256xf32>
    %4 = vector.shape_cast %3 : vector<1x32x256xf32> to vector<32x256xf32>
    %cst = arith.constant dense<0.000000e+00> : vector<6x256xf32>
    %5 = tpu.matmul %0, %4, %cst {dimension_numbers = #tpu.dot_dimension_numbers<[1], [0], [0], [1], [0, 0, 1, 1], [], []>} : vector<6x32xf32>, vector<32x256xf32>, vector<6x256xf32> -> vector<6x256xf32>
    %c0_6 = arith.constant 0 : index
    %c0_7 = arith.constant 0 : index
    %6 = vector.load %arg5[%c0_6, %c0_7] : memref<6x256xf32, #tpu.memory_space<vmem>>, vector<6x256xf32>
    tpu.vector_store %arg5[%c0_6, %c0_7], %5 {strides = array<i32>} : memref<6x256xf32, #tpu.memory_space<vmem>>, vector<6x256xf32>,
    %7 = tpu.iota {dimensions = array<i32: 1>} : vector<1x400xi32>
    %8 = arith.sitofp %7 : vector<1x400xi32> to vector<1x400xf32>
    %cst_8 = arith.constant 5.000000e-01 : f32
    %9 = vector.broadcast %cst_8 : f32 to vector<1x400xf32>
    %10 = arith.addf %8, %9 : vector<1x400xf32>
    %cst_9 = arith.constant 5.000000e-02 : f32
    %11 = vector.broadcast %cst_9 : f32 to vector<1x400xf32>
    %12 = arith.mulf %10, %11 : vector<1x400xf32>
    %13 = math.floor %12 : vector<1x400xf32>
    %14 = arith.fptosi %13 : vector<1x400xf32> to vector<1x400xi32>
    %c20_i32 = arith.constant 20 : i32
    %15 = vector.broadcast %c20_i32 : i32 to vector<1x400xi32>
    %16 = arith.muli %14, %15 : vector<1x400xi32>
    %17 = arith.subi %7, %16 : vector<1x400xi32>
    %c0_i32 = arith.constant 0 : i32
    %18 = vector.broadcast %c0_i32 : i32 to vector<1x400xi32>
    %19 = arith.cmpi eq, %14, %18 : vector<1x400xi32>
    %c19_i32 = arith.constant 19 : i32
    %20 = vector.broadcast %c19_i32 : i32 to vector<1x400xi32>
    %21 = arith.cmpi eq, %14, %20 : vector<1x400xi32>
    %22 = arith.ori %19, %21 : vector<1x400xi1>
    %c0_i32_10 = arith.constant 0 : i32
    %23 = vector.broadcast %c0_i32_10 : i32 to vector<1x400xi32>
    %24 = arith.cmpi eq, %17, %23 : vector<1x400xi32>
    %25 = arith.ori %22, %24 : vector<1x400xi1>
    %c19_i32_11 = arith.constant 19 : i32
    %26 = vector.broadcast %c19_i32_11 : i32 to vector<1x400xi32>
    %27 = arith.cmpi eq, %17, %26 : vector<1x400xi32>
    %28 = arith.ori %25, %27 : vector<1x400xi1>
    %29 = arith.extui %28 : vector<1x400xi1> to vector<1x400xi32>
    %30 = arith.sitofp %29 : vector<1x400xi32> to vector<1x400xf32>
    %31 = vector.broadcast %2 : vector<6x1xf32> to vector<6x400xf32>
    %32 = vector.broadcast %30 : vector<1x400xf32> to vector<6x400xf32>
    %33 = arith.mulf %31, %32 : vector<6x400xf32>
    %34 = vector.broadcast %1 : vector<6x1xf32> to vector<6x400xf32>
    %35 = arith.addf %34, %33 : vector<6x400xf32>
    %c0_12 = arith.constant 0 : index
    %c0_13 = arith.constant 0 : index
    %c0_14 = arith.constant 0 : index
    %36 = vector.load %arg2[%c0_12, %c0_13, %c0_14] : memref<1x6x400xf32, #tpu.memory_space<vmem>>, vector<1x6x400xf32>
    %37 = vector.shape_cast %36 : vector<1x6x400xf32> to vector<6x400xf32>
    %38 = arith.addf %37, %35 : vector<6x400xf32>
    %c0_15 = arith.constant 0 : index
    %c0_16 = arith.constant 0 : index
    %c0_17 = arith.constant 0 : index
    %39 = vector.load %arg4[%c0_15, %c0_16, %c0_17] : memref<1x6x400xf32, #tpu.memory_space<vmem>>, vector<1x6x400xf32>
    %40 = vector.shape_cast %39 : vector<1x6x400xf32> to vector<6x400xf32>
    %41 = vector.shape_cast %38 : vector<6x400xf32> to vector<1x6x400xf32>
    tpu.vector_store %arg4[%c0_15, %c0_16, %c0_17], %41 {strides = array<i32>} : memref<1x6x400xf32, #tpu.memory_space<vmem>>, vector<1x6x400xf32>,
    %c0_18 = arith.constant 0 : index
    %c0_19 = arith.constant 0 : index
    %c42 = arith.constant 42 : index
    %42 = vector.load %arg4[%c0_18, %c0_19, %c42] : memref<1x6x400xf32, #tpu.memory_space<vmem>>, vector<1x6x16xf32>
    %43 = vector.shape_cast %42 : vector<1x6x16xf32> to vector<6x16xf32>
    %c0_20 = arith.constant 0 : index
    %c0_21 = arith.constant 0 : index
    %44 = vector.load %arg5[%c0_20, %c0_21] : memref<6x256xf32, #tpu.memory_space<vmem>>, vector<6x16xf32>
    %45 = arith.addf %43, %44 : vector<6x16xf32>
    %c0_22 = arith.constant 0 : index
    %c0_23 = arith.constant 0 : index
    %c42_24 = arith.constant 42 : index
    %46 = vector.load %arg4[%c0_22, %c0_23, %c42_24] : memref<1x6x400xf32, #tpu.memory_space<vmem>>, vector<1x6x16xf32>
    %47 = vector.shape_cast %46 : vector<1x6x16xf32> to vector<6x16xf32>
    %48 = vector.shape_cast %45 : vector<6x16xf32> to vector<1x6x16xf32>
    tpu.vector_store %arg4[%c0_22, %c0_23, %c42_24], %48 {strides = array<i32>} : memref<1x6x400xf32, #tpu.memory_space<vmem>>, vector<1x6x16xf32>,
    %c0_25 = arith.constant 0 : index
    %c0_26 = arith.constant 0 : index
    %c62 = arith.constant 62 : index
    %49 = vector.load %arg4[%c0_25, %c0_26, %c62] : memref<1x6x400xf32, #tpu.memory_space<vmem>>, vector<1x6x16xf32>
    %50 = vector.shape_cast %49 : vector<1x6x16xf32> to vector<6x16xf32>
    %c0_27 = arith.constant 0 : index
    %c16 = arith.constant 16 : index
    %51 = vector.load %arg5[%c0_27, %c16] : memref<6x256xf32, #tpu.memory_space<vmem>>, vector<6x16xf32>
    %52 = arith.addf %50, %51 : vector<6x16xf32>
    %c0_28 = arith.constant 0 : index
    %c0_29 = arith.constant 0 : index
    %c62_30 = arith.constant 62 : index
    %53 = vector.load %arg4[%c0_28, %c0_29, %c62_30] : memref<1x6x400xf32, #tpu.memory_space<vmem>>, vector<1x6x16xf32>
    %54 = vector.shape_cast %53 : vector<1x6x16xf32> to vector<6x16xf32>
    %55 = vector.shape_cast %52 : vector<6x16xf32> to vector<1x6x16xf32>
    tpu.vector_store %arg4[%c0_28, %c0_29, %c62_30], %55 {strides = array<i32>} : memref<1x6x400xf32, #tpu.memory_space<vmem>>, vector<1x6x16xf32>,
    %c0_31 = arith.constant 0 : index
    %c0_32 = arith.constant 0 : index
    %c82 = arith.constant 82 : index
    %56 = vector.load %arg4[%c0_31, %c0_32, %c82] : memref<1x6x400xf32, #tpu.memory_space<vmem>>, vector<1x6x16xf32>
    %57 = vector.shape_cast %56 : vector<1x6x16xf32> to vector<6x16xf32>
    %c0_33 = arith.constant 0 : index
    %c32_34 = arith.constant 32 : index
    %58 = vector.load %arg5[%c0_33, %c32_34] : memref<6x256xf32, #tpu.memory_space<vmem>>, vector<6x16xf32>
    %59 = arith.addf %57, %58 : vector<6x16xf32>
    %c0_35 = arith.constant 0 : index
    %c0_36 = arith.constant 0 : index
    %c82_37 = arith.constant 82 : index
    %60 = vector.load %arg4[%c0_35, %c0_36, %c82_37] : memref<1x6x400xf32, #tpu.memory_space<vmem>>, vector<1x6x16xf32>
    %61 = vector.shape_cast %60 : vector<1x6x16xf32> to vector<6x16xf32>
    %62 = vector.shape_cast %59 : vector<6x16xf32> to vector<1x6x16xf32>
    tpu.vector_store %arg4[%c0_35, %c0_36, %c82_37], %62 {strides = array<i32>} : memref<1x6x400xf32, #tpu.memory_space<vmem>>, vector<1x6x16xf32>,
    %c0_38 = arith.constant 0 : index
    %c0_39 = arith.constant 0 : index
    %c102 = arith.constant 102 : index
    %63 = vector.load %arg4[%c0_38, %c0_39, %c102] : memref<1x6x400xf32, #tpu.memory_space<vmem>>, vector<1x6x16xf32>
    %64 = vector.shape_cast %63 : vector<1x6x16xf32> to vector<6x16xf32>
    %c0_40 = arith.constant 0 : index
    %c48 = arith.constant 48 : index
    %65 = vector.load %arg5[%c0_40, %c48] : memref<6x256xf32, #tpu.memory_space<vmem>>, vector<6x16xf32>
    %66 = arith.addf %64, %65 : vector<6x16xf32>
    %c0_41 = arith.constant 0 : index
    %c0_42 = arith.constant 0 : index
    %c102_43 = arith.constant 102 : index
    %67 = vector.load %arg4[%c0_41, %c0_42, %c102_43] : memref<1x6x400xf32, #tpu.memory_space<vmem>>, vector<1x6x16xf32>
    %68 = vector.shape_cast %67 : vector<1x6x16xf32> to vector<6x16xf32>
    %69 = vector.shape_cast %66 : vector<6x16xf32> to vector<1x6x16xf32>
    tpu.vector_store %arg4[%c0_41, %c0_42, %c102_43], %69 {strides = array<i32>} : memref<1x6x400xf32, #tpu.memory_space<vmem>>, vector<1x6x16xf32>,
    %c0_44 = arith.constant 0 : index
    %c0_45 = arith.constant 0 : index
    %c122 = arith.constant 122 : index
    %70 = vector.load %arg4[%c0_44, %c0_45, %c122] : memref<1x6x400xf32, #tpu.memory_space<vmem>>, vector<1x6x16xf32>
    %71 = vector.shape_cast %70 : vector<1x6x16xf32> to vector<6x16xf32>
    %c0_46 = arith.constant 0 : index
    %c64 = arith.constant 64 : index
    %72 = vector.load %arg5[%c0_46, %c64] : memref<6x256xf32, #tpu.memory_space<vmem>>, vector<6x16xf32>
    %73 = arith.addf %71, %72 : vector<6x16xf32>
    %c0_47 = arith.constant 0 : index
    %c0_48 = arith.constant 0 : index
    %c122_49 = arith.constant 122 : index
    %74 = vector.load %arg4[%c0_47, %c0_48, %c122_49] : memref<1x6x400xf32, #tpu.memory_space<vmem>>, vector<1x6x16xf32>
    %75 = vector.shape_cast %74 : vector<1x6x16xf32> to vector<6x16xf32>
    %76 = vector.shape_cast %73 : vector<6x16xf32> to vector<1x6x16xf32>
    tpu.vector_store %arg4[%c0_47, %c0_48, %c122_49], %76 {strides = array<i32>} : memref<1x6x400xf32, #tpu.memory_space<vmem>>, vector<1x6x16xf32>,
    %c0_50 = arith.constant 0 : index
    %c0_51 = arith.constant 0 : index
    %c142 = arith.constant 142 : index
    %77 = vector.load %arg4[%c0_50, %c0_51, %c142] : memref<1x6x400xf32, #tpu.memory_space<vmem>>, vector<1x6x16xf32>
    %78 = vector.shape_cast %77 : vector<1x6x16xf32> to vector<6x16xf32>
    %c0_52 = arith.constant 0 : index
    %c80 = arith.constant 80 : index
    %79 = vector.load %arg5[%c0_52, %c80] : memref<6x256xf32, #tpu.memory_space<vmem>>, vector<6x16xf32>
    %80 = arith.addf %78, %79 : vector<6x16xf32>
    %c0_53 = arith.constant 0 : index
    %c0_54 = arith.constant 0 : index
    %c142_55 = arith.constant 142 : index
    %81 = vector.load %arg4[%c0_53, %c0_54, %c142_55] : memref<1x6x400xf32, #tpu.memory_space<vmem>>, vector<1x6x16xf32>
    %82 = vector.shape_cast %81 : vector<1x6x16xf32> to vector<6x16xf32>
    %83 = vector.shape_cast %80 : vector<6x16xf32> to vector<1x6x16xf32>
    tpu.vector_store %arg4[%c0_53, %c0_54, %c142_55], %83 {strides = array<i32>} : memref<1x6x400xf32, #tpu.memory_space<vmem>>, vector<1x6x16xf32>,
    %c0_56 = arith.constant 0 : index
    %c0_57 = arith.constant 0 : index
    %c162 = arith.constant 162 : index
    %84 = vector.load %arg4[%c0_56, %c0_57, %c162] : memref<1x6x400xf32, #tpu.memory_space<vmem>>, vector<1x6x16xf32>
    %85 = vector.shape_cast %84 : vector<1x6x16xf32> to vector<6x16xf32>
    %c0_58 = arith.constant 0 : index
    %c96 = arith.constant 96 : index
    %86 = vector.load %arg5[%c0_58, %c96] : memref<6x256xf32, #tpu.memory_space<vmem>>, vector<6x16xf32>
    %87 = arith.addf %85, %86 : vector<6x16xf32>
    %c0_59 = arith.constant 0 : index
    %c0_60 = arith.constant 0 : index
    %c162_61 = arith.constant 162 : index
    %88 = vector.load %arg4[%c0_59, %c0_60, %c162_61] : memref<1x6x400xf32, #tpu.memory_space<vmem>>, vector<1x6x16xf32>
    %89 = vector.shape_cast %88 : vector<1x6x16xf32> to vector<6x16xf32>
    %90 = vector.shape_cast %87 : vector<6x16xf32> to vector<1x6x16xf32>
    tpu.vector_store %arg4[%c0_59, %c0_60, %c162_61], %90 {strides = array<i32>} : memref<1x6x400xf32, #tpu.memory_space<vmem>>, vector<1x6x16xf32>,
    %c0_62 = arith.constant 0 : index
    %c0_63 = arith.constant 0 : index
    %c182 = arith.constant 182 : index
    %91 = vector.load %arg4[%c0_62, %c0_63, %c182] : memref<1x6x400xf32, #tpu.memory_space<vmem>>, vector<1x6x16xf32>
    %92 = vector.shape_cast %91 : vector<1x6x16xf32> to vector<6x16xf32>
    %c0_64 = arith.constant 0 : index
    %c112 = arith.constant 112 : index
    %93 = vector.load %arg5[%c0_64, %c112] : memref<6x256xf32, #tpu.memory_space<vmem>>, vector<6x16xf32>
    %94 = arith.addf %92, %93 : vector<6x16xf32>
    %c0_65 = arith.constant 0 : index
    %c0_66 = arith.constant 0 : index
    %c182_67 = arith.constant 182 : index
    %95 = vector.load %arg4[%c0_65, %c0_66, %c182_67] : memref<1x6x400xf32, #tpu.memory_space<vmem>>, vector<1x6x16xf32>
    %96 = vector.shape_cast %95 : vector<1x6x16xf32> to vector<6x16xf32>
    %97 = vector.shape_cast %94 : vector<6x16xf32> to vector<1x6x16xf32>
    tpu.vector_store %arg4[%c0_65, %c0_66, %c182_67], %97 {strides = array<i32>} : memref<1x6x400xf32, #tpu.memory_space<vmem>>, vector<1x6x16xf32>,
    %c0_68 = arith.constant 0 : index
    %c0_69 = arith.constant 0 : index
    %c202 = arith.constant 202 : index
    %98 = vector.load %arg4[%c0_68, %c0_69, %c202] : memref<1x6x400xf32, #tpu.memory_space<vmem>>, vector<1x6x16xf32>
    %99 = vector.shape_cast %98 : vector<1x6x16xf32> to vector<6x16xf32>
    %c0_70 = arith.constant 0 : index
    %c128 = arith.constant 128 : index
    %100 = vector.load %arg5[%c0_70, %c128] : memref<6x256xf32, #tpu.memory_space<vmem>>, vector<6x16xf32>
    %101 = arith.addf %99, %100 : vector<6x16xf32>
    %c0_71 = arith.constant 0 : index
    %c0_72 = arith.constant 0 : index
    %c202_73 = arith.constant 202 : index
    %102 = vector.load %arg4[%c0_71, %c0_72, %c202_73] : memref<1x6x400xf32, #tpu.memory_space<vmem>>, vector<1x6x16xf32>
    %103 = vector.shape_cast %102 : vector<1x6x16xf32> to vector<6x16xf32>
    %104 = vector.shape_cast %101 : vector<6x16xf32> to vector<1x6x16xf32>
    tpu.vector_store %arg4[%c0_71, %c0_72, %c202_73], %104 {strides = array<i32>} : memref<1x6x400xf32, #tpu.memory_space<vmem>>, vector<1x6x16xf32>,
    %c0_74 = arith.constant 0 : index
    %c0_75 = arith.constant 0 : index
    %c222 = arith.constant 222 : index
    %105 = vector.load %arg4[%c0_74, %c0_75, %c222] : memref<1x6x400xf32, #tpu.memory_space<vmem>>, vector<1x6x16xf32>
    %106 = vector.shape_cast %105 : vector<1x6x16xf32> to vector<6x16xf32>
    %c0_76 = arith.constant 0 : index
    %c144 = arith.constant 144 : index
    %107 = vector.load %arg5[%c0_76, %c144] : memref<6x256xf32, #tpu.memory_space<vmem>>, vector<6x16xf32>
    %108 = arith.addf %106, %107 : vector<6x16xf32>
    %c0_77 = arith.constant 0 : index
    %c0_78 = arith.constant 0 : index
    %c222_79 = arith.constant 222 : index
    %109 = vector.load %arg4[%c0_77, %c0_78, %c222_79] : memref<1x6x400xf32, #tpu.memory_space<vmem>>, vector<1x6x16xf32>
    %110 = vector.shape_cast %109 : vector<1x6x16xf32> to vector<6x16xf32>
    %111 = vector.shape_cast %108 : vector<6x16xf32> to vector<1x6x16xf32>
    tpu.vector_store %arg4[%c0_77, %c0_78, %c222_79], %111 {strides = array<i32>} : memref<1x6x400xf32, #tpu.memory_space<vmem>>, vector<1x6x16xf32>,
    %c0_80 = arith.constant 0 : index
    %c0_81 = arith.constant 0 : index
    %c242 = arith.constant 242 : index
    %112 = vector.load %arg4[%c0_80, %c0_81, %c242] : memref<1x6x400xf32, #tpu.memory_space<vmem>>, vector<1x6x16xf32>
    %113 = vector.shape_cast %112 : vector<1x6x16xf32> to vector<6x16xf32>
    %c0_82 = arith.constant 0 : index
    %c160 = arith.constant 160 : index
    %114 = vector.load %arg5[%c0_82, %c160] : memref<6x256xf32, #tpu.memory_space<vmem>>, vector<6x16xf32>
    %115 = arith.addf %113, %114 : vector<6x16xf32>
    %c0_83 = arith.constant 0 : index
    %c0_84 = arith.constant 0 : index
    %c242_85 = arith.constant 242 : index
    %116 = vector.load %arg4[%c0_83, %c0_84, %c242_85] : memref<1x6x400xf32, #tpu.memory_space<vmem>>, vector<1x6x16xf32>
    %117 = vector.shape_cast %116 : vector<1x6x16xf32> to vector<6x16xf32>
    %118 = vector.shape_cast %115 : vector<6x16xf32> to vector<1x6x16xf32>
    tpu.vector_store %arg4[%c0_83, %c0_84, %c242_85], %118 {strides = array<i32>} : memref<1x6x400xf32, #tpu.memory_space<vmem>>, vector<1x6x16xf32>,
    %c0_86 = arith.constant 0 : index
    %c0_87 = arith.constant 0 : index
    %c262 = arith.constant 262 : index
    %119 = vector.load %arg4[%c0_86, %c0_87, %c262] : memref<1x6x400xf32, #tpu.memory_space<vmem>>, vector<1x6x16xf32>
    %120 = vector.shape_cast %119 : vector<1x6x16xf32> to vector<6x16xf32>
    %c0_88 = arith.constant 0 : index
    %c176 = arith.constant 176 : index
    %121 = vector.load %arg5[%c0_88, %c176] : memref<6x256xf32, #tpu.memory_space<vmem>>, vector<6x16xf32>
    %122 = arith.addf %120, %121 : vector<6x16xf32>
    %c0_89 = arith.constant 0 : index
    %c0_90 = arith.constant 0 : index
    %c262_91 = arith.constant 262 : index
    %123 = vector.load %arg4[%c0_89, %c0_90, %c262_91] : memref<1x6x400xf32, #tpu.memory_space<vmem>>, vector<1x6x16xf32>
    %124 = vector.shape_cast %123 : vector<1x6x16xf32> to vector<6x16xf32>
    %125 = vector.shape_cast %122 : vector<6x16xf32> to vector<1x6x16xf32>
    tpu.vector_store %arg4[%c0_89, %c0_90, %c262_91], %125 {strides = array<i32>} : memref<1x6x400xf32, #tpu.memory_space<vmem>>, vector<1x6x16xf32>,
    %c0_92 = arith.constant 0 : index
    %c0_93 = arith.constant 0 : index
    %c282 = arith.constant 282 : index
    %126 = vector.load %arg4[%c0_92, %c0_93, %c282] : memref<1x6x400xf32, #tpu.memory_space<vmem>>, vector<1x6x16xf32>
    %127 = vector.shape_cast %126 : vector<1x6x16xf32> to vector<6x16xf32>
    %c0_94 = arith.constant 0 : index
    %c192 = arith.constant 192 : index
    %128 = vector.load %arg5[%c0_94, %c192] : memref<6x256xf32, #tpu.memory_space<vmem>>, vector<6x16xf32>
    %129 = arith.addf %127, %128 : vector<6x16xf32>
    %c0_95 = arith.constant 0 : index
    %c0_96 = arith.constant 0 : index
    %c282_97 = arith.constant 282 : index
    %130 = vector.load %arg4[%c0_95, %c0_96, %c282_97] : memref<1x6x400xf32, #tpu.memory_space<vmem>>, vector<1x6x16xf32>
    %131 = vector.shape_cast %130 : vector<1x6x16xf32> to vector<6x16xf32>
    %132 = vector.shape_cast %129 : vector<6x16xf32> to vector<1x6x16xf32>
    tpu.vector_store %arg4[%c0_95, %c0_96, %c282_97], %132 {strides = array<i32>} : memref<1x6x400xf32, #tpu.memory_space<vmem>>, vector<1x6x16xf32>,
    %c0_98 = arith.constant 0 : index
    %c0_99 = arith.constant 0 : index
    %c302 = arith.constant 302 : index
    %133 = vector.load %arg4[%c0_98, %c0_99, %c302] : memref<1x6x400xf32, #tpu.memory_space<vmem>>, vector<1x6x16xf32>
    %134 = vector.shape_cast %133 : vector<1x6x16xf32> to vector<6x16xf32>
    %c0_100 = arith.constant 0 : index
    %c208 = arith.constant 208 : index
    %135 = vector.load %arg5[%c0_100, %c208] : memref<6x256xf32, #tpu.memory_space<vmem>>, vector<6x16xf32>
    %136 = arith.addf %134, %135 : vector<6x16xf32>
    %c0_101 = arith.constant 0 : index
    %c0_102 = arith.constant 0 : index
    %c302_103 = arith.constant 302 : index
    %137 = vector.load %arg4[%c0_101, %c0_102, %c302_103] : memref<1x6x400xf32, #tpu.memory_space<vmem>>, vector<1x6x16xf32>
    %138 = vector.shape_cast %137 : vector<1x6x16xf32> to vector<6x16xf32>
    %139 = vector.shape_cast %136 : vector<6x16xf32> to vector<1x6x16xf32>
    tpu.vector_store %arg4[%c0_101, %c0_102, %c302_103], %139 {strides = array<i32>} : memref<1x6x400xf32, #tpu.memory_space<vmem>>, vector<1x6x16xf32>,
    %c0_104 = arith.constant 0 : index
    %c0_105 = arith.constant 0 : index
    %c322 = arith.constant 322 : index
    %140 = vector.load %arg4[%c0_104, %c0_105, %c322] : memref<1x6x400xf32, #tpu.memory_space<vmem>>, vector<1x6x16xf32>
    %141 = vector.shape_cast %140 : vector<1x6x16xf32> to vector<6x16xf32>
    %c0_106 = arith.constant 0 : index
    %c224 = arith.constant 224 : index
    %142 = vector.load %arg5[%c0_106, %c224] : memref<6x256xf32, #tpu.memory_space<vmem>>, vector<6x16xf32>
    %143 = arith.addf %141, %142 : vector<6x16xf32>
    %c0_107 = arith.constant 0 : index
    %c0_108 = arith.constant 0 : index
    %c322_109 = arith.constant 322 : index
    %144 = vector.load %arg4[%c0_107, %c0_108, %c322_109] : memref<1x6x400xf32, #tpu.memory_space<vmem>>, vector<1x6x16xf32>
    %145 = vector.shape_cast %144 : vector<1x6x16xf32> to vector<6x16xf32>
    %146 = vector.shape_cast %143 : vector<6x16xf32> to vector<1x6x16xf32>
    tpu.vector_store %arg4[%c0_107, %c0_108, %c322_109], %146 {strides = array<i32>} : memref<1x6x400xf32, #tpu.memory_space<vmem>>, vector<1x6x16xf32>,
    %c0_110 = arith.constant 0 : index
    %c0_111 = arith.constant 0 : index
    %c342 = arith.constant 342 : index
    %147 = vector.load %arg4[%c0_110, %c0_111, %c342] : memref<1x6x400xf32, #tpu.memory_space<vmem>>, vector<1x6x16xf32>
    %148 = vector.shape_cast %147 : vector<1x6x16xf32> to vector<6x16xf32>
    %c0_112 = arith.constant 0 : index
    %c240 = arith.constant 240 : index
    %149 = vector.load %arg5[%c0_112, %c240] : memref<6x256xf32, #tpu.memory_space<vmem>>, vector<6x16xf32>
    %150 = arith.addf %148, %149 : vector<6x16xf32>
    %c0_113 = arith.constant 0 : index
    %c0_114 = arith.constant 0 : index
    %c342_115 = arith.constant 342 : index
    %151 = vector.load %arg4[%c0_113, %c0_114, %c342_115] : memref<1x6x400xf32, #tpu.memory_space<vmem>>, vector<1x6x16xf32>
    %152 = vector.shape_cast %151 : vector<1x6x16xf32> to vector<6x16xf32>
    %153 = vector.shape_cast %150 : vector<6x16xf32> to vector<1x6x16xf32>
    tpu.vector_store %arg4[%c0_113, %c0_114, %c342_115], %153 {strides = array<i32>} : memref<1x6x400xf32, #tpu.memory_space<vmem>>, vector<1x6x16xf32>,
    return
  }
  func.func @transform_0(%arg0: i32) -> (i32, i32, i32) {
    %c0_i32 = arith.constant 0 : i32
    %c0_i32_0 = arith.constant 0 : i32
    %c0_i32_1 = arith.constant 0 : i32
    return %arg0, %c0_i32, %c0_i32_0 : i32, i32, i32
  }
  func.func @transform_1(%arg0: i32) -> (i32, i32, i32) {
    %c0_i32 = arith.constant 0 : i32
    %c0_i32_0 = arith.constant 0 : i32
    %c0_i32_1 = arith.constant 0 : i32
    return %arg0, %c0_i32, %c0_i32_0 : i32, i32, i32
  }
  func.func @transform_2(%arg0: i32) -> (i32, i32) {
    %c0_i32 = arith.constant 0 : i32
    %c0_i32_0 = arith.constant 0 : i32
    %c0_i32_1 = arith.constant 0 : i32
    return %c0_i32, %c0_i32_0 : i32, i32
  }
  func.func @transform_3(%arg0: i32) -> (i32, i32, i32) {
    %c0_i32 = arith.constant 0 : i32
    %c0_i32_0 = arith.constant 0 : i32
    %c0_i32_1 = arith.constant 0 : i32
    return %arg0, %c0_i32, %c0_i32_0 : i32, i32, i32
  }
}

</mosaic_0001>

<bundles_post_ra>
// kernel: model_forward.1
= control target key start
LH: loop header
LB: loop body
LE: loop exit
PB: predicated region body
PF: predicated region fallthrough
CT: control target
= control target key end

     0   :  { %s707_s12 = smov 0   ;;  %s789_s0 = inlined_call_operand.vmem [shape: f32[2,32,256], index: 0, kind: input, shape index: {}]   ;;  %s790_s1 = inlined_call_operand.vmem [shape: f32[2,6,400], index: 1, kind: input, shape index: {}]   ;;  %s791_s2 = inlined_call_operand.vmem [shape: f32[6,34], index: 2, kind: input, shape index: {}]   ;;  %s792_s3 = inlined_call_operand.vmem [shape: f32[2,6,400], index: 3, kind: output, shape index: {}]  }
   0x1 LB: > { %s594_s13 = sadd.s32 4294967295, %s666_s12   ;;  %p598_p0 = scmp.ge.s32.totalorder %s666_s12, 1  ;;  %s666_s12 = sphi %s707_s12, %s13_s12  }
   0x2   : > { %p147_p1 = scmp.lt.s32.totalorder %s666_s12, 3 }
   0x4   : > { %p148_p2 = pnand %p598_p0, %p147_p1 }
   0x5   : > { %p176_p3 = scmp.lt.s32.totalorder (!%p148_p2), %s594_s13, 1  ;;  %v668_v0 = vmov (!%p148_p2), 0.0   ;;  %v191_v1 = vld [vmem:[%s791_s2] sm:$0x3f] (!%p148_p2)  ;;  %v669_v2 = vmov (!%p148_p2), 33   ;;  %v670_v6 = vmov (!%p148_p2), 32   ;;  %v277_v16 = vlaneseq (!%p148_p2) }
   0x6   : > { %151 = sbr.rel (%p148_p2) target bundleno = 425 (0x1a9), region = 32  ;;  %268 = vmatprep.mubr.f32.mxu0 (!%p148_p2), %v668_v0  ;;  %658 = vset.pattern.permute.xlu0 (!%p148_p2), %v669_v2  ;;  %vm200_vm0 = vcmask (!%p148_p2), 261120   ;;  %s671_s27 = smov (!%p148_p2), 58  }
   0x7   : > { %347 = vperm.xlu0 (!%p148_p2), %658, %v191_v1   ;;  %v278_v17 = vand.u32 (!%p148_p2), 127, %v277_v16  ;;  %s672_s28 = smov (!%p148_p2), 42   ;;  %s673_s29 = smov (!%p148_p2), 62  }
   0x8   : > { %s674_s30 = smov (!%p148_p2), 86   ;;  %s675_s4 = smov (!%p148_p2), 70  }
   0x9   : > { %v279_v18 = vadd.s32 (!%p148_p2), 128, %v278_v17  ;;  %v280_v19 = vadd.s32 (!%p148_p2), 256, %v278_v17  ;;  %v281_v20 = vadd.s32 (!%p148_p2), 384, %v278_v17  ;;  %v282_v21 = vcvt.s32.f32 (!%p148_p2), %v278_v17  ;;  %s676_s5 = smov (!%p148_p2), 82   ;;  %s677_s6 = smov (!%p148_p2), 50  }
   0xa   : > { %s678_s7 = smov (!%p148_p2), 66   ;;  %s679_s8 = smov (!%p148_p2), 94  }
   0xb   : > { %659 = vset.pattern.permute.xlu0 (!%p148_p2), %v670_v6  ;;  %v283_v22 = vcvt.s32.f32 (!%p148_p2), %v279_v18  ;;  %v284_v23 = vcvt.s32.f32 (!%p148_p2), %v280_v19  ;;  %v285_v24 = vcvt.s32.f32 (!%p148_p2), %v281_v20  ;;  %v286_v25 = vadd.f32 (!%p148_p2), 0.5, %v282_v21  ;;  %s680_s9 = smov (!%p148_p2), 46   ;;  %s681_s10 = smov (!%p148_p2), 90  }
   0xc   : > { %355 = vperm.xlu0 (!%p148_p2), %659, %v191_v1   ;;  %s682_s11 = smov (!%p148_p2), 78   ;;  %s684_s14 = smov (!%p148_p2), 74  }
   0xd   : > { %s794_s13 = smov (!%p176_p3, %s594_s13), 1  ;;  %v287_v26 = vadd.f32 0.5, %v283_v22  ;;  %v288_v27 = vadd.f32 0.5, %v284_v23  ;;  %v289_v28 = vadd.f32 0.5, %v285_v24  ;;  %v290_v29 = vmul.f32 0.05, %v286_v25 }
   0xe   : > { %s612_s16 = sshll.u32 %s794_s13, 6  ;;  %s613_s20 = sshll.u32 %s794_s13, 5 }
   0xf   : > { %s180_s19 = scalar_lea.vmem %s789_s0, %s612_s16  ;;  %v291_v30 = vmul.f32 0.05, %v287_v26  ;;  %v292_v31 = vmul.f32 0.05, %v288_v27  ;;  %v293_v32 = vmul.f32 0.05, %v289_v28  ;;  %v294_v33 = vfloor.f32 %v290_v29  ;;  %s185_s23 = scalar_lea.vmem %s790_s1, %s613_s20 }
  0x10   : > { %v193_v3 = vld [vmem:[%s180_s19 + $0x8] sm:$0xff]  ;;  %v195_v4 = vld [vmem:[%s180_s19 + $0x18] sm:$0xff]  ;;  %v192_v5 = vld [vmem:[%s180_s19] sm:$0xff]  ;;  %s736_s26 = scalar_lea.vmem %s792_s3, %s613_s20  ;;  %s683_s13 = smov 102  }
  0x11   : > { %v615_v7 = vpack.c.bf16 %v195_v4, %v193_v3  ;;  %v194_v8 = vld [vmem:[%s180_s19 + $0x10] sm:$0xff]  ;;  %v197_v9 = vld [vmem:[%s180_s19 + $0x28] sm:$0xff]  ;;  %v199_v10 = vld [vmem:[%s180_s19 + $0x38] sm:$0xff]  ;;  %v295_v34 = vfloor.f32 %v291_v30  ;;  %v296_v35 = vfloor.f32 %v292_v31  ;;  %v297_v36 = vfloor.f32 %v293_v32  ;;  %s685_s15 = smov 54   ;;  %s686_s16 = smov 98  }
  0x12   : > { %v617_v11 = vpack.c.bf16 %v194_v8, %v192_v5  ;;  %v619_v12 = vpack.c.bf16 %v199_v10, %v197_v9  ;;  %v196_v13 = vld [vmem:[%s180_s19 + $0x20] sm:$0xff]  ;;  %v198_v14 = vld [vmem:[%s180_s19 + $0x30] sm:$0xff]  ;;  %v623_v37 = vtrunc.f32 %v294_v33  ;;  %v365_v6 = vld [vmem:[%s185_s23 + $0x18] sm:$0x3f] }
  0x13   : > { %616 = vmatprep.subr.bf16.mxu0 %v615_v7  ;;  %v621_v15 = vpack.c.bf16 %v198_v14, %v196_v13  ;;  %v625_v39 = vtrunc.f32 %v295_v34  ;;  %v627_v40 = vtrunc.f32 %v296_v35  ;;  %v629_v41 = vtrunc.f32 %v297_v36  ;;  %v362_v60 = vld [vmem:[%s185_s23] sm:$0x3f]  ;;  %v364_v4 = vld [vmem:[%s185_s23 + $0x10] sm:$0x3f] }
  0x14   : > { %618 = vmatpush1.bf16.msra.mxu0 %v617_v11  ;;  %v624_v38 = vcvt.f32.s32 %v623_v37 }
  0x15   : > { %620 = vmatprep.subr.bf16.mxu0 %v619_v12  ;;  %v626_v42 = vcvt.f32.s32 %v625_v39  ;;  %v628_v43 = vcvt.f32.s32 %v627_v40  ;;  %v630_v44 = vcvt.f32.s32 %v629_v41 }
  0x16   : > { %v302_v45 = vmul.u32 20, %v624_v38  ;;  %vm310_vm1 = vcmp.eq.s32.totalorder %v624_v38, 0  ;;  %vm314_vm2 = vcmp.eq.s32.totalorder %v624_v38, 19 }
  0x17   : > { %v303_v46 = vmul.u32 20, %v626_v42  ;;  %v304_v47 = vmul.u32 20, %v628_v43  ;;  %vm311_vm3 = vcmp.eq.s32.totalorder %v626_v42, 0  ;;  %vm312_vm4 = vcmp.eq.s32.totalorder %v628_v43, 0  ;;  %vm318_vm7 = vmor %vm310_vm1, %vm314_vm2 }
  0x18   : > { %622 = vmatpush1.bf16.msra.mxu0 %v621_v15  ;;  %v306_v48 = vsub.s32 %v278_v17, %v302_v45  ;;  %v305_v49 = vmul.u32 20, %v630_v44  ;;  %vm313_vm5 = vcmp.eq.s32.totalorder %v630_v44, 0  ;;  %vm315_vm6 = vcmp.eq.s32.totalorder %v626_v42, 19 }
  0x19   : > { %v307_v50 = vsub.s32 %v279_v18, %v303_v46  ;;  %v308_v51 = vsub.s32 %v280_v19, %v304_v47  ;;  %vm316_vm8 = vcmp.eq.s32.totalorder %v628_v43, 19  ;;  %vm317_vm9 = vcmp.eq.s32.totalorder %v630_v44, 19  ;;  %vm319_vm10 = vmor %vm311_vm3, %vm315_vm6 }
  0x1a   : > { %v309_v52 = vsub.s32 %v281_v20, %v305_v49  ;;  %vm320_vm11 = vmor %vm312_vm4, %vm316_vm8  ;;  %vm322_vm12 = vcmp.eq.s32.totalorder %v306_v48, 0  ;;  %vm330_vm3 = vcmp.eq.s32.totalorder %v306_v48, 19 }
  0x1b   : > { %605 = vmatmul.mubr.msk.f32.vlgmr.msra.gmra.mrb[0].mxu0 %vm200_vm0, %v191_v1  ;;  %vm321_vm13 = vmor %vm313_vm5, %vm317_vm9  ;;  %vm323_vm14 = vcmp.eq.s32.totalorder %v307_v50, 0  ;;  %vm324_vm15 = vcmp.eq.s32.totalorder %v308_v51, 0  ;;  %vm331_vm4 = vcmp.eq.s32.totalorder %v307_v50, 19  ;;  %vm332_vm5 = vcmp.eq.s32.totalorder %v308_v51, 19  ;;  %v363_v1 = vld [vmem:[%s185_s23 + $0x8] sm:$0x3f] }
  0x1c   : > { %vm325_vm0 = vcmp.eq.s32.totalorder %v309_v52, 0  ;;  %vm326_vm1 = vmor %vm318_vm7, %vm322_vm12  ;;  %vm333_vm9 = vcmp.eq.s32.totalorder %v309_v52, 19 }
  0x1d   : > { %vm327_vm2 = vmor %vm319_vm10, %vm323_vm14 }
  0x1e   : > { %vm328_vm6 = vmor %vm320_vm11, %vm324_vm15  ;;  %vm373_vm11 = vcmask 128000   ;;  %vm382_vm15 = vcmask 472400  }
  0x1f   : > { %vm329_vm8 = vmor %vm321_vm13, %vm325_vm0  ;;  %vm422_vm13 = vcmask 78848   ;;  %vm480_vm0 = vcmask 13312  }
  0x20   : > { %vm334_vm7 = vmor %vm326_vm1, %vm330_vm3  ;;  %vm431_vm1 = vcmask 242800   ;;  %vm489_vm3 = vcmask 177200  }
  0x21   : > { %vm335_vm12 = vmor %vm327_vm2, %vm331_vm4  ;;  %v606_v54 = vsel %vm334_vm7, 1.0, %v668_v0  ;;  %vm391_vm2 = vcmask 636400   ;;  %vm400_vm4 = vcmask 800400   ;;  %vm507_vm7 = vcmask 505200  }
  0x22   : > { %vm336_vm10 = vmor %vm328_vm6, %vm332_vm5  ;;  %v607_v56 = vsel %vm335_vm12, 1.0, %v668_v0  ;;  %vm440_vm6 = vcmask 406800   ;;  %vm449_vm5 = vcmask 570800   ;;  %vm458_vm12 = vcmask 734800  }
  0x23   : > { %vm337_vm14 = vmor %vm329_vm8, %vm333_vm9  ;;  %v608_v58 = vsel %vm336_vm10, 1.0, %v668_v0  ;;  %vm498_vm8 = vcmask 341200   ;;  %vm409_vm9 = vcmask 964400   ;;  %vm420_vm10 = vcmask 1046480  }
  0x24   : > { %v609_v61 = vsel %vm337_vm14, 1.0, %v668_v0  ;;  %vm516_vm14 = vcmask 669200  }
  0x86   : > { %v348_v53 = vpop.permute.xlu0 %347 }
  0x87   : > { %v350_v57 = vmul.f32 %v606_v54, %v348_v53  ;;  %v351_v59 = vmul.f32 %v607_v56, %v348_v53  ;;  %v352_v62 = vmul.f32 %v608_v58, %v348_v53  ;;  %v353_v2 = vmul.f32 %v609_v61, %v348_v53 }
  0x8b   : > { %v356_v55 = vpop.permute.xlu0 %355 }
  0x8c   : > { %v358_v63 = vadd.f32 %v356_v55, %v350_v57  ;;  %v359_v3 = vadd.f32 %v356_v55, %v351_v59  ;;  %v360_v5 = vadd.f32 %v356_v55, %v352_v62  ;;  %v361_v8 = vadd.f32 %v356_v55, %v353_v2 }
  0x8e   : > { %v366_v7 = vadd.f32 %v362_v60, %v358_v63  ;;  %v367_v0 = vadd.f32 %v363_v1, %v359_v3  ;;  %v368_v9 = vadd.f32 %v364_v4, %v360_v5  ;;  %v369_v10 = vadd.f32 %v365_v6, %v361_v8 }
  0x90   : > { %370 = vst [vmem:[%s736_s26] sm:$0x3f] %v366_v7  ;;  %371 = vst [vmem:[%s736_s26 + $0x8] sm:$0x3f] %v367_v0 }
  0x91   : > { %372 = vst [vmem:[%s736_s26 + $0x10] sm:$0x3f] %v368_v9  ;;  %374 = vst.msk [vmem:[%s736_s26 + $0x18] sm:$0x3f] %vm373_vm11, %v369_v10  ;;  %vm467_vm11 = vcmask 898800  }
  0x97   : > { %v412_v29 = vld [vmem:[%s736_s26 + $0x8] sm:$0x3f]  ;;  %v375_v31 = vld [vmem:[%s736_s26] sm:$0x3f] }
  0x98   : > { %v470_v36 = vld [vmem:[%s736_s26 + $0x10] sm:$0x3f] }
  0xee   : > { %v270_v11 = vpop.f32.mrb[0].mxu0 }
  0xef   : > { %275 = vst [vmem:[#allocation2] sm:$0x3f] %v270_v11  ;;  %v272_v12 = vpop.f32.mrb[1].mxu0 }
  0xf0   : > { %276 = vst [vmem:[#allocation2 + $0x8] sm:$0x3f] %v272_v12 }
  0xf6   : > { %v413_v13 = vld [vmem:[#allocation2] sm:$0x3f] }
  0xf7   : > { %v376_v14 = vld [vmem:[#allocation2] sm:$0x3f]  ;;  %415 = vrot.lane.b32.xlu1 %v413_v13, %s671_s27  ;;  %v483_v16 = vld [vmem:[#allocation2 + $0x8] sm:$0x3f] }
  0xf8   : > { %378 = vrot.lane.b32.xlu0 %v376_v14, %s672_s28  ;;  %v425_v15 = vld [vmem:[#allocation2] sm:$0x3f]  ;;  %v471_v18 = vld [vmem:[#allocation2 + $0x8] sm:$0x3f] }
  0xf9   : > { %v443_v17 = vld [vmem:[#allocation2] sm:$0x3f]  ;;  %v501_v21 = vld [vmem:[#allocation2 + $0x8] sm:$0x3f] }
  0xfa   : > { %v394_v19 = vld [vmem:[#allocation2] sm:$0x3f]  ;;  %v492_v23 = vld [vmem:[#allocation2 + $0x8] sm:$0x3f] }
  0xfb   : > { %427 = vrot.lane.b32.xlu1 %v425_v15, %s673_s29  ;;  %v434_v20 = vld [vmem:[#allocation2] sm:$0x3f]  ;;  %v461_v24 = vld [vmem:[#allocation2 + $0x8] sm:$0x3f] }
  0xfc   : > { %485 = vrot.lane.b32.xlu0 %v483_v16, %s674_s30  ;;  %v385_v22 = vld [vmem:[#allocation2] sm:$0x3f]  ;;  %v519_v25 = vld [vmem:[#allocation2 + $0x8] sm:$0x3f] }
  0xfd   : > { %v452_v26 = vld [vmem:[#allocation2 + $0x8] sm:$0x3f]  ;;  %v403_v27 = vld [vmem:[#allocation2] sm:$0x3f] }
  0xfe   : > { %v510_v28 = vld [vmem:[#allocation2 + $0x8] sm:$0x3f] }
  0xff   : > { %473 = vrot.lane.b32.xlu1 %v471_v18, %s676_s5 }
 0x100   : > { %445 = vrot.lane.b32.xlu0 %v443_v17, %s675_s4 }
 0x103   : > { %436 = vrot.lane.b32.xlu1 %v434_v20, %s678_s7 }
 0x104   : > { %396 = vrot.lane.b32.xlu0 %v394_v19, %s677_s6 }
 0x107   : > { %387 = vrot.lane.b32.xlu1 %v385_v22, %s680_s9 }
 0x108   : > { %503 = vrot.lane.b32.xlu0 %v501_v21, %s679_s8 }
 0x10b   : > { %494 = vrot.lane.b32.xlu1 %v492_v23, %s681_s10 }
 0x10c   : > { %463 = vrot.lane.b32.xlu0 %v461_v24, %s682_s11 }
 0x10f   : > { %454 = vrot.lane.b32.xlu1 %v452_v26, %s684_s14 }
 0x110   : > { %521 = vrot.lane.b32.xlu0 %v519_v25, %s683_s13 }
 0x113   : > { %405 = vrot.lane.b32.xlu1 %v403_v27, %s685_s15 }
 0x117   : > { %512 = vrot.lane.b32.xlu1 %v510_v28, %s686_s16 }
 0x169   : > { %v743_v30 = vpop.permute.xlu1 %415 }
 0x16a   : > { %v379_v32 = vpop.permute.xlu0 %378  ;;  %v419_v33 = vadd.f32 %v743_v30, %v412_v29 }
 0x16b   : > { %v381_v34 = vadd.f32 %v379_v32, %v375_v31 }
 0x16c   : > { %423 = vst.msk [vmem:[%s736_s26 + $0x8] sm:$0x3f] %vm422_vm13, %v419_v33  ;;  %vm525_vm13 = vcmask 833200  }
 0x16d   : > { %383 = vst.msk [vmem:[%s736_s26] sm:$0x3f] %vm382_vm15, %v381_v34  ;;  %v428_v35 = vpop.permute.xlu1 %427  ;;  %vm478_vm15 = vcmask 1046416  }
 0x16e   : > { %v486_v42 = vpop.permute.xlu0 %485 }
 0x171   : > { %v750_v37 = vpop.permute.xlu1 %473 }
 0x172   : > { %v477_v38 = vadd.f32 %v750_v37, %v470_v36  ;;  %v446_v48 = vpop.permute.xlu0 %445 }
 0x173   : > { %v424_v39 = vld [vmem:[%s736_s26 + $0x8] sm:$0x3f] }
 0x174   : > { %v430_v40 = vadd.f32 %v428_v35, %v424_v39  ;;  %481 = vst.msk [vmem:[%s736_s26 + $0x10] sm:$0x3f] %vm480_vm0, %v477_v38  ;;  %v384_v43 = vld [vmem:[%s736_s26] sm:$0x3f] }
 0x175   : > { %v437_v41 = vpop.permute.xlu1 %436 }
 0x176   : > { %432 = vst.msk [vmem:[%s736_s26 + $0x8] sm:$0x3f] %vm431_vm1, %v430_v40  ;;  %v397_v52 = vpop.permute.xlu0 %396 }
 0x179   : > { %v388_v44 = vpop.permute.xlu1 %387 }
 0x17a   : > { %v390_v45 = vadd.f32 %v388_v44, %v384_v43  ;;  %v504_v63 = vpop.permute.xlu0 %503 }
 0x17b   : > { %v482_v46 = vld [vmem:[%s736_s26 + $0x10] sm:$0x3f] }
 0x17c   : > { %v488_v47 = vadd.f32 %v486_v42, %v482_v46  ;;  %392 = vst.msk [vmem:[%s736_s26] sm:$0x3f] %vm391_vm2, %v390_v45 }
 0x17d   : > { %v433_v49 = vld [vmem:[%s736_s26 + $0x8] sm:$0x3f]  ;;  %v495_v51 = vpop.permute.xlu1 %494 }
 0x17e   : > { %490 = vst.msk [vmem:[%s736_s26 + $0x10] sm:$0x3f] %vm489_vm3, %v488_v47  ;;  %v439_v50 = vadd.f32 %v437_v41, %v433_v49  ;;  %v464_v9 = vpop.permute.xlu0 %463 }
 0x180   : > { %441 = vst.msk [vmem:[%s736_s26 + $0x8] sm:$0x3f] %vm440_vm6, %v439_v50 }
 0x181   : > { %v455_v58 = vpop.permute.xlu1 %454 }
 0x182   : > { %v522_v12 = vpop.permute.xlu0 %521 }
 0x183   : > { %v393_v53 = vld [vmem:[%s736_s26] sm:$0x3f] }
 0x184   : > { %v399_v54 = vadd.f32 %v397_v52, %v393_v53 }
 0x185   : > { %v491_v55 = vld [vmem:[%s736_s26 + $0x10] sm:$0x3f]  ;;  %v406_v61 = vpop.permute.xlu1 %405 }
 0x186   : > { %401 = vst.msk [vmem:[%s736_s26] sm:$0x3f] %vm400_vm4, %v399_v54  ;;  %v497_v56 = vadd.f32 %v495_v51, %v491_v55 }
 0x187   : > { %v442_v57 = vld [vmem:[%s736_s26 + $0x8] sm:$0x3f] }
 0x188   : > { %v448_v59 = vadd.f32 %v446_v48, %v442_v57  ;;  %499 = vst.msk [vmem:[%s736_s26 + $0x10] sm:$0x3f] %vm498_vm8, %v497_v56 }
 0x189   : > { %v513_v8 = vpop.permute.xlu1 %512 }
 0x18a   : > { %450 = vst.msk [vmem:[%s736_s26 + $0x8] sm:$0x3f] %vm449_vm5, %v448_v59 }
 0x18d   : > { %v402_v60 = vld [vmem:[%s736_s26] sm:$0x3f] }
 0x18e   : > { %v408_v62 = vadd.f32 %v406_v61, %v402_v60 }
 0x18f   : > { %v500_v1 = vld [vmem:[%s736_s26 + $0x10] sm:$0x3f] }
 0x190   : > { %v506_v2 = vadd.f32 %v504_v63, %v500_v1  ;;  %410 = vst.msk [vmem:[%s736_s26] sm:$0x3f] %vm409_vm9, %v408_v62 }
 0x191   : > { %v451_v3 = vld [vmem:[%s736_s26 + $0x8] sm:$0x3f] }
 0x192   : > { %508 = vst.msk [vmem:[%s736_s26 + $0x10] sm:$0x3f] %vm507_vm7, %v506_v2  ;;  %v457_v4 = vadd.f32 %v455_v58, %v451_v3 }
 0x194   : > { %459 = vst.msk [vmem:[%s736_s26 + $0x8] sm:$0x3f] %vm458_vm12, %v457_v4 }
 0x197   : > { %v411_v5 = vld [vmem:[%s736_s26] sm:$0x3f] }
 0x198   : > { %v418_v6 = vadd.f32 %v743_v30, %v411_v5 }
 0x199   : > { %v509_v7 = vld [vmem:[%s736_s26 + $0x10] sm:$0x3f] }
 0x19a   : > { %421 = vst.msk [vmem:[%s736_s26] sm:$0x3f] %vm420_vm10, %v418_v6  ;;  %v515_v0 = vadd.f32 %v513_v8, %v509_v7 }
 0x19b   : > { %v460_v10 = vld [vmem:[%s736_s26 + $0x8] sm:$0x3f] }
 0x19c   : > { %v466_v11 = vadd.f32 %v464_v9, %v460_v10  ;;  %517 = vst.msk [vmem:[%s736_s26 + $0x10] sm:$0x3f] %vm516_vm14, %v515_v0 }
 0x19e   : > { %468 = vst.msk [vmem:[%s736_s26 + $0x8] sm:$0x3f] %vm467_vm11, %v466_v11 }
 0x1a3   : > { %v518_v13 = vld [vmem:[%s736_s26 + $0x10] sm:$0x3f] }
 0x1a4   : > { %v524_v14 = vadd.f32 %v522_v12, %v518_v13 }
 0x1a5   : > { %v469_v15 = vld [vmem:[%s736_s26 + $0x8] sm:$0x3f] }
 0x1a6   : > { %v476_v16 = vadd.f32 %v750_v37, %v469_v15  ;;  %526 = vst.msk [vmem:[%s736_s26 + $0x10] sm:$0x3f] %vm525_vm13, %v524_v14 }
 0x1a8   : > { %479 = vst.msk [vmem:[%s736_s26 + $0x8] sm:$0x3f] %vm478_vm15, %v476_v16 }
 0x1a9 PF: > { %s13_s12 = sadd.s32 1, %s666_s12  }
 0x1aa   : > { %p10_p4 = scmp.ge.s32.totalorder %s13_s12, 4  }
 0x1ac   :  { %12 = sbr.rel (!%p10_p4) target bundleno = 1 (0x1), region = 65 }

</bundles_post_ra>
